<compile_context>
chip_gen: v5e
topology: v5e:2x2
jax: 0.10.0
libtpu: 0.0.40
codegen_flags: <defaults>
</compile_context>

<pallas_src>
import functools

import jax
import jax.numpy as jnp
from jax.experimental import pallas as pl
from jax.experimental.pallas import tpu as pltpu


def _pow_int(y, power: int):
    """y ** power for a positive integer power, via squaring (static unroll)."""
    acc = None
    base = y
    p = power
    while p > 0:
        if p & 1:
            acc = base if acc is None else acc * base
        p >>= 1
        if p:
            base = base * base
    return acc


def _power_relu_kernel(x_ref, o_ref, *, power: int, compute_dtype):
    x = x_ref[...].astype(compute_dtype)
    y = jnp.maximum(x, jnp.zeros((), compute_dtype))
    o_ref[...] = _pow_int(y, power).astype(o_ref.dtype)


_LANE_WIDTHS = (2048, 1024, 512, 256, 128)   # candidates for lane-dense last dim
_KERNEL_DTYPES = (jnp.float32, jnp.bfloat16, jnp.float16)


def _round_up(v: int, m: int) -> int:
    return ((v + m - 1) // m) * m


def _chip_config():
    """(tensorcores_per_chip, target_block_bytes, vmem_limit_bytes, has_bf16_vpu)."""
    kind = ""
    try:
        kind = jax.devices()[0].device_kind.lower()
    except Exception:
        pass

    if "v7" in kind or "7x" in kind:
        # 2 TCs/chip, 3.2 TB/s HBM, only 64 MiB physical VMEM per TC.
        cores, target_block, vmem_limit, bf16_vpu = 2, 4 << 20, 48 << 20, True
    elif "v6" in kind:
        # 1 TC/chip, 128 MiB VMEM: 4 buffers x 4 MiB sits well inside 32 MiB.
        cores, target_block, vmem_limit, bf16_vpu = 1, 4 << 20, 32 << 20, True
    else:
        # v5e / unknown: 2 MiB is already >=85% of the ~0.8 TB/s roofline.
        cores, target_block, vmem_limit, bf16_vpu = 1, 2 << 20, 32 << 20, False

    # Never let the scoped limit exceed ~75% of physical VMEM (matters on v7x).
    try:
        phys = int(pltpu.get_tpu_info().vmem_capacity_bytes)
        vmem_limit = min(vmem_limit, (phys * 3) // 4)
    except Exception:
        pass
    return cores, target_block, vmem_limit, bf16_vpu


def power_relu(x: jax.Array, power: int = 3) -> jax.Array:
    """Elementwise relu(x)**power (positive integer power), any shape."""
    if not isinstance(power, int) or power < 1:
        raise ValueError("power_relu requires a positive integer power")

    orig_shape = x.shape
    dtype = x.dtype
    n = 1
    for d in orig_shape:
        n *= d

    # Ragged (numel not a multiple of 128) or unsupported-dtype inputs: plain
    # XLA is already at HBM roofline for an elementwise op and avoids the
    # pad + slice extra HBM passes the old kernel path paid.
    if n == 0 or n % 128 != 0 or dtype not in _KERNEL_DTYPES:
        return (jnp.maximum(x, 0) ** power).astype(dtype)

    cores, target_block_bytes, vmem_limit, bf16_vpu = _chip_config()

    itemsize = jnp.dtype(dtype).itemsize
    sub = {1: 32, 2: 16}.get(itemsize, 8)    # dtype-aware sublane granularity

    # Widest lane-dense last dim that divides n exactly; prefer one that also
    # leaves >= sub rows so vregs are sublane-dense.
    width = None
    for w in _LANE_WIDTHS:
        if n % w == 0 and (n // w) >= sub:
            width = w
            break
    if width is None:
        width = next(w for w in _LANE_WIDTHS if n % w == 0)

    rows = n // width
    slab = x.reshape(rows, width)

    # Row-block sized for ~target_block_bytes (generation-aware).
    row_bytes = width * itemsize
    if rows <= sub:
        br = rows                             # block row dim == full array dim
    else:
        br = max(sub, (target_block_bytes // row_bytes) // sub * sub)
        br = min(br, (rows // sub) * sub)     # ragged tail handled by cdiv grid
        if cores >= 2:
            # Multi-TC chip (v7x): keep >= ~8 grid steps (>=4 per TensorCore)
            # so each core retains prefetch/writeback overlap and the ragged
            # final block can't leave one core with half the work.
            br = min(br, _round_up(pl.cdiv(rows, 8), sub))

    grid = (pl.cdiv(rows, br),)               # ragged last block masked by Pallas

    # bf16 compute on chips with a bf16 VPU halves in-kernel temporary
    # footprint; f32 otherwise (and always for f32/f16 inputs).
    compute_dtype = dtype if (bf16_vpu and dtype == jnp.bfloat16) else jnp.float32

    out = pl.pallas_call(
        functools.partial(_power_relu_kernel, power=power,
                          compute_dtype=compute_dtype),
        out_shape=jax.ShapeDtypeStruct((rows, width), dtype),
        grid=grid,
        in_specs=[pl.BlockSpec((br, width), lambda i: (i, 0))],
        out_specs=pl.BlockSpec((br, width), lambda i: (i, 0)),
        compiler_params=pltpu.CompilerParams(
            dimension_semantics=("parallel",),
            vmem_limit_bytes=vmem_limit,
        ),
    )(slab)

    return out.reshape(orig_shape)


if __name__ == "__main__":
    key = jax.random.PRNGKey(0)

    # Shape implied by the module's (N, *) contract: NCHW (2, 4, 16, 16)
    x = jax.random.normal(key, (2, 4, 16, 16), dtype=jnp.float32)
    y = power_relu(x, power=3)
    jax.block_until_ready(y)
    y_ref = jnp.maximum(x, 0.0) ** 3
    assert y.shape == x.shape and y.dtype == x.dtype
    assert jnp.allclose(y, y_ref, atol=1e-6, rtol=1e-6)

    # Ragged numel (not a multiple of 128): exercises the plain-XLA fallback.
    x2 = jax.random.normal(jax.random.PRNGKey(1), (3, 5, 17, 13), dtype=jnp.float32)
    y2 = power_relu(x2, power=4)
    jax.block_until_ready(y2)
    assert jnp.allclose(y2, jnp.maximum(x2, 0.0) ** 4, atol=1e-5, rtol=1e-5)

    # Aligned multi-row case: exercises the tiled / multi-step grid path.
    x3 = jax.random.normal(jax.random.PRNGKey(2), (8, 32, 128), dtype=jnp.float32)
    y3 = power_relu(x3, power=2)
    jax.block_until_ready(y3)
    assert jnp.allclose(y3, jnp.maximum(x3, 0.0) ** 2, atol=1e-6, rtol=1e-6)

    print("KERNEL_OK")
</pallas_src>

<mosaic_0001>
module attributes {stable_mosaic.version = 11 : i64} {
  func.func @_power_relu_kernel(%arg0: i32, %arg1: memref<8x256xf32, #tpu.memory_space<vmem>>, %arg2: memref<8x256xf32, #tpu.memory_space<vmem>>) attributes {dimension_semantics = [#tpu.dimension_semantics<parallel>], iteration_bounds = array<i64: 1>, scalar_prefetch = 0 : i64, scratch_operands = 0 : i64, tpu.core_type = #tpu.core_type<tc>, window_params = [{transform_indices = @transform_0, window_bounds = array<i64: 8, 256>}, {transform_indices = @transform_1, window_bounds = array<i64: 8, 256>}]} {
    %c0 = arith.constant 0 : index
    %c0_0 = arith.constant 0 : index
    %0 = vector.load %arg1[%c0, %c0_0] : memref<8x256xf32, #tpu.memory_space<vmem>>, vector<8x256xf32>
    %cst = arith.constant 0.000000e+00 : f32
    %1 = vector.broadcast %cst : f32 to vector<8x256xf32>
    %2 = arith.maximumf %0, %1 : vector<8x256xf32>
    %3 = arith.mulf %2, %2 : vector<8x256xf32>
    %4 = arith.mulf %2, %3 : vector<8x256xf32>
    %c0_1 = arith.constant 0 : index
    %c0_2 = arith.constant 0 : index
    %5 = vector.load %arg2[%c0_1, %c0_2] : memref<8x256xf32, #tpu.memory_space<vmem>>, vector<8x256xf32>
    tpu.vector_store %arg2[%c0_1, %c0_2], %4 {strides = array<i32>} : memref<8x256xf32, #tpu.memory_space<vmem>>, vector<8x256xf32>,
    return
  }
  func.func @transform_0(%arg0: i32) -> (i32, i32) {
    %c0_i32 = arith.constant 0 : i32
    %c0_i32_0 = arith.constant 0 : i32
    return %arg0, %c0_i32 : i32, i32
  }
  func.func @transform_1(%arg0: i32) -> (i32, i32) {
    %c0_i32 = arith.constant 0 : i32
    %c0_i32_0 = arith.constant 0 : i32
    return %arg0, %c0_i32 : i32, i32
  }
}

</mosaic_0001>

<bundles_post_ra>
// kernel: tpu_custom_call.1
= control target key start
LH: loop header
LB: loop body
LE: loop exit
PB: predicated region body
PF: predicated region fallthrough
CT: control target
= control target key end

     0   :  { %6 = vsyncpa [#allocation3], 0  ;;  %s122_s0 = inlined_call_operand.hbm [shape: f32[8,256], index: 0, kind: input, shape index: {}]   ;;  %s123_s1 = inlined_call_operand.hbm [shape: f32[8,256], index: 1, kind: output, shape index: {}]  }
   0x1   :  { %7 = vsyncpa [#allocation4], 0  ;;  %s13_s8 = sshll.u32 %s122_s0, 4  ;;  %s104_s9 = smov [#allocation2]   ;;  %s14_s8 = int_to_ptr.hbm [resolvable:$true] %s13_s8 }
   0x2   :  { %s15_s10 = sshll.u32 %s104_s9, 4  ;;  %s16_s10 = int_to_ptr.vmem [resolvable:$true] %s15_s10 }
   0x3   :  { %18 = dma.hbm_to_vmem [thread:$0]  %s14_s8, 256, %s16_s10, [#allocation3]  }
   0x4   :  { %100 = dma.done.wait [#allocation3], 256  }
   0x5   :  { %101 = vsyncadd [#allocation3], 4294967040  ;;  %v23_v0 = vld [vmem:[#allocation2] sm:$0xff]  ;;  %v24_v1 = vld [vmem:[#allocation2 + $0x8] sm:$0xff]  ;;  %s105_s11 = smov [#allocation5]   ;;  %s40_s15 = sshll.u32 %s123_s1, 4  ;;  %s41_s15 = int_to_ptr.hbm [resolvable:$true] %s40_s15 }
   0x6   :  { %v25_v2 = vmax.f32 %v23_v0, 0.0  ;;  %v26_v3 = vmax.f32 %v24_v1, 0.0  ;;  %s38_s12 = sshll.u32 %s105_s11, 4  ;;  %s39_s12 = int_to_ptr.vmem [resolvable:$true] %s38_s12 }
   0x8   :  { %v27_v4 = vmul.f32 %v25_v2, %v25_v2  ;;  %v28_v5 = vmul.f32 %v26_v3, %v26_v3 }
   0xa   :  { %v29_v6 = vmul.f32 %v27_v4, %v25_v2  ;;  %v30_v7 = vmul.f32 %v28_v5, %v26_v3 }
   0xc   :  { %31 = vst [vmem:[#allocation5] sm:$0xff] %v29_v6 }
   0xd   :  { %32 = vst [vmem:[#allocation5 + $0x8] sm:$0xff] %v30_v7 }
   0xe   :  { %43 = dma.vmem_to_hbm [thread:$0]  %s39_s12, 256, %s41_s15, [#allocation4]  }
   0xf   :  { %102 = dma.done.wait [#allocation4], 256  }
  0x10   :  { %103 = vsyncadd [#allocation4], 4294967040 }
  0x11   :  { %48 = vsyncpa [#allocation3], 1 }
  0x12   :  { %49 = vsyncpa [#allocation4], 1 }

</bundles_post_ra>
